<compile_context>
chip_gen: v7x
topology: tpu7x:2x2x1
jax: 0.10.0
libtpu: 0.0.40
codegen_flags: <defaults>
</compile_context>

<pallas_src>
import math
from functools import partial

import jax
import jax.numpy as jnp
from jax import lax
from jax.experimental import pallas as pl
from jax.experimental.pallas import tpu as pltpu


# ----------------------------------------------------------------------------
# Linear kernel: y = x @ W + b   (W stored [in, out] = torch weight.T, in bf16)
# ----------------------------------------------------------------------------

def _linear_kernel(x_ref, w_ref, b_ref, o_ref):
    x = x_ref[...].astype(jnp.bfloat16)          # matmul operands in bf16
    o_ref[...] = (
        jnp.dot(x, w_ref[...], preferred_element_type=jnp.float32)  # f32 acc
        + b_ref[...]
    )


def linear(x, w_bf16, b):
    m = x.shape[0]
    n = w_bf16.shape[1]
    return pl.pallas_call(
        _linear_kernel,
        out_shape=jax.ShapeDtypeStruct((m, n), jnp.float32),
        in_specs=[pl.BlockSpec(memory_space=pltpu.MemorySpace.VMEM)] * 3,
        out_specs=pl.BlockSpec(memory_space=pltpu.MemorySpace.VMEM),
    )(x, w_bf16, b.reshape(1, n))


# ----------------------------------------------------------------------------
# Ti-scaled cross-attention (stand-in for the external Ti-based Transformer)
# ----------------------------------------------------------------------------

def _cross_attn_kernel(q_ref, kv_ref, ti_ref, mask_ref, o_ref):
    # TODO(synk): the real `Transformer` (6-layer enc/dec with Ti weighting) is
    # defined outside this file; approximated by one ti-scaled cross-attention.
    enc = kv_ref[...] * ti_ref[...]                          # [B,S,D] * [B,S,1]
    q = q_ref[...]                                           # [B, 1, D]
    d = q.shape[-1]
    s = jnp.einsum("bqd,bsd->bqs", q, enc,
                   preferred_element_type=jnp.float32) * (1.0 / math.sqrt(d))
    mask = mask_ref[...][:, None, :]                         # [B, 1, S]
    s = jnp.where(mask > 0, s, -1e9)
    s = s - jnp.max(s, axis=-1, keepdims=True)
    p = jnp.exp(s)
    # softmax denominator on the (otherwise idle) EUP slot
    p = p * pl.reciprocal(jnp.sum(p, axis=-1, keepdims=True), approx=True)
    o_ref[...] = jnp.einsum("bqs,bsd->bqd", p, enc,
                            preferred_element_type=jnp.float32)


def cross_attention(q, kv, ti, mask):
    b, _, d = q.shape
    return pl.pallas_call(
        _cross_attn_kernel,
        out_shape=jax.ShapeDtypeStruct((b, 1, d), jnp.float32),
        in_specs=[pl.BlockSpec(memory_space=pltpu.MemorySpace.VMEM)] * 4,
        out_specs=pl.BlockSpec(memory_space=pltpu.MemorySpace.VMEM),
    )(q, kv, ti, mask)


# ----------------------------------------------------------------------------
# Fused ComplEx scoring + KLDiv(kge_loss) over the entity table.
#
#   * one full-ent_dim matmul per entity tile (re.re^T + im.im^T ==
#     concat(re,im) @ concat(re_t,im_t)^T), bf16 operands / f32 accumulation
#   * online (flash-style) log-softmax stats so the [B, num_entities] score
#     matrix is never materialized in HBM or VMEM
#   * analytic label-smoothed targets driven by integer tail indices
#   * padded tail tile masked via a global-index compare (num_e need not be a
#     multiple of tile_e)
# ----------------------------------------------------------------------------

def _complex_score_loss_kernel(tails_ref, head_ref, rel_ref, bn_ref, e_ref,
                               loss_ref,
                               s_sc, m_sc, l_sc, ssum_sc, slab_sc,
                               *, num_e, t_base, t_lab, entropy_total):
    j = pl.program_id(0)
    tile_e = e_ref.shape[0]

    @pl.when(j == 0)
    def _init():
        # ComplEx "prepare" (bn0 affine -> complex Hadamard -> bn2 affine),
        # done once and kept resident as a concatenated [B, ent_dim] bf16 vector.
        bn = bn_ref[...]                                     # [4, ent_dim]
        h = head_ref[...] * bn[0:1, :] + bn[1:2, :]
        r = rel_ref[...]
        half = h.shape[1] // 2
        re_h, im_h = h[:, :half], h[:, half:]
        re_r, im_r = r[:, :half], r[:, half:]
        re_s = re_h * re_r - im_h * im_r
        im_s = re_h * im_r + im_h * re_r
        s = jnp.concatenate([re_s, im_s], axis=1) * bn[2:3, :] + bn[3:4, :]
        s_sc[...] = s.astype(jnp.bfloat16)
        m_sc[...] = jnp.full(m_sc.shape, -1e30, jnp.float32)
        l_sc[...] = jnp.zeros(l_sc.shape, jnp.float32)
        ssum_sc[...] = jnp.zeros(ssum_sc.shape, jnp.float32)
        slab_sc[...] = jnp.zeros(slab_sc.shape, jnp.float32)
        loss_ref[...] = jnp.zeros(loss_ref.shape, jnp.float32)

    # single full-width matmul against this entity tile: [B, tile_e]
    dn = (((1,), (1,)), ((), ()))
    scores = lax.dot_general(s_sc[...], e_ref[...], dn,
                             preferred_element_type=jnp.float32)

    idx = j * tile_e + lax.broadcasted_iota(jnp.int32, scores.shape, 1)
    valid = idx < num_e                          # mask padded entity columns
    match = idx == tails_ref[...]                # one-hot tail column per row

    scores_v = jnp.where(valid, scores, -1e30)
    m_new = jnp.maximum(m_sc[...], jnp.max(scores_v, axis=1, keepdims=True))
    alpha = jnp.exp(m_sc[...] - m_new)
    l_sc[...] = alpha * l_sc[...] + jnp.sum(jnp.exp(scores_v - m_new),
                                            axis=1, keepdims=True)
    m_sc[...] = m_new
    ssum_sc[...] += jnp.sum(jnp.where(valid, scores, 0.0), axis=1, keepdims=True)
    slab_sc[...] += jnp.sum(jnp.where(match, scores, 0.0), axis=1, keepdims=True)

    @pl.when(j == pl.num_programs(0) - 1)
    def _finalize():
        # KLDiv(sum) = sum_b [ sum_e t*log t  -  sum_e t*logp ]
        # with smoothed+L1-normalized targets:
        #   sum_e t*logp = t_base*(sum_e s - ne*logZ) + (t_lab-t_base)*(s_lab - logZ)
        log_z = m_sc[...] + jnp.log(l_sc[...])               # [B, 1]
        cross = (t_base * (ssum_sc[...] - float(num_e) * log_z)
                 + (t_lab - t_base) * (slab_sc[...] - log_z))
        loss_ref[...] = jnp.reshape(
            jnp.float32(entropy_total) - jnp.sum(cross), (1, 1))


def complex_score_kge_loss(head, rel_embedding, bn_pack, ent_emb_bf16,
                           tail_idx, *, num_entities, label_smoothing,
                           tile_e=512):
    b, ent_dim = head.shape
    n_tiles = pl.cdiv(num_entities, tile_e)
    num_e_pad = n_tiles * tile_e
    pad = num_e_pad - ent_emb_bf16.shape[0]
    if pad > 0:
        # TODO(synk): at production scale pre-pad the entity table once, offline.
        ent_emb_bf16 = jnp.pad(ent_emb_bf16, ((0, pad), (0, 0)))

    # Analytic label-smoothed, L1-normalized target values (single-answer case).
    ne = float(num_entities)
    ls = float(label_smoothing)
    if ls:
        denom = 2.0 - ls                      # L1 norm of (1-ls)*onehot + 1/ne
        t_base = (1.0 / ne) / denom
        t_lab = ((1.0 - ls) + 1.0 / ne) / denom
    else:
        t_base, t_lab = 0.0, 1.0
    ent_base = (ne - 1.0) * t_base * math.log(t_base) if t_base > 0.0 else 0.0
    ent_lab = t_lab * math.log(t_lab) if t_lab > 0.0 else 0.0
    entropy_total = b * (ent_base + ent_lab)  # sum_b sum_e t*log t (constant)

    kernel = partial(_complex_score_loss_kernel,
                     num_e=num_entities, t_base=t_base, t_lab=t_lab,
                     entropy_total=entropy_total)

    out = pl.pallas_call(
        kernel,
        out_shape=jax.ShapeDtypeStruct((1, 1), jnp.float32),
        grid_spec=pltpu.PrefetchScalarGridSpec(
            num_scalar_prefetch=0,
            grid=(n_tiles,),
            in_specs=[
                pl.BlockSpec((b, 1), lambda j: (0, 0)),             # tail idx
                pl.BlockSpec((b, ent_dim), lambda j: (0, 0)),       # head
                pl.BlockSpec((b, ent_dim), lambda j: (0, 0)),       # relation
                pl.BlockSpec((4, ent_dim), lambda j: (0, 0)),       # bn affine
                pl.BlockSpec((tile_e, ent_dim), lambda j: (j, 0)),  # entity tile
            ],
            out_specs=pl.BlockSpec((1, 1), lambda j: (0, 0)),
            scratch_shapes=[
                pltpu.VMEM((b, ent_dim), jnp.bfloat16),  # prepared score vector
                pltpu.VMEM((b, 1), jnp.float32),         # running max
                pltpu.VMEM((b, 1), jnp.float32),         # running sum-exp
                pltpu.VMEM((b, 1), jnp.float32),         # running sum of scores
                pltpu.VMEM((b, 1), jnp.float32),         # score at the label
            ]),
        compiler_params=pltpu.CompilerParams(
            # Entity axis carries the loss accumulation -> arbitrary (sequential).
            # TODO(synk): on v7x the entity axis could be core-sharded with
            # per-core partial stats + a cross-core reduction; kept single-core.
            dimension_semantics=("arbitrary",),
            vmem_limit_bytes=32 * 1024 * 1024),  # v5e default scoped VMEM is 16MiB
    )(tail_idx.reshape(b, 1).astype(jnp.int32), head, rel_embedding,
      bn_pack, ent_emb_bf16)
    return out[0, 0]


# ----------------------------------------------------------------------------
# Model wrapper (glue in plain JAX: embedding lookups, reshapes)
# ----------------------------------------------------------------------------

def make_params(key, *, num_entities, num_relations, ent_dim, rel_emb_dim,
                hidden_dim, d_model, relation_dim_out):
    ks = jax.random.split(key, 8)

    def lin(k, fan_in, fan_out):
        bound = 1.0 / math.sqrt(fan_in)
        kw, kb = jax.random.split(k)
        w = jax.random.uniform(kw, (fan_in, fan_out), jnp.float32, -bound, bound)
        b = jax.random.uniform(kb, (fan_out,), jnp.float32, -bound, bound)
        return w.astype(jnp.bfloat16), b          # weights streamed as bf16

    params = {}
    # Entity table stored in bf16: halves HBM traffic of the dominant scan.
    params["entity_emb"] = (jax.random.normal(
        ks[0], (num_entities, ent_dim), jnp.float32) * 0.1).astype(jnp.bfloat16)
    params["rel_emb"] = jax.random.normal(
        ks[1], (num_relations, rel_emb_dim), jnp.float32) * 0.1
    params["half_w"], params["half_b"] = lin(ks[2], rel_emb_dim, 256)   # halfRelDim2Tranf
    params["b2t_w"], params["b2t_b"] = lin(ks[3], hidden_dim, d_model)  # bert2tranf
    params["h2r_w"], params["h2r_b"] = lin(ks[4], d_model, relation_dim_out)  # hidden2rel_base
    # BatchNorm1d(2) eval-mode folded affine: row0 = scale, row1 = shift per channel
    eps = 1e-5
    scale = 1.0 / math.sqrt(1.0 + eps)
    params["bn0"] = jnp.array([[scale, scale], [0.0, 0.0]], jnp.float32)
    params["bn2"] = jnp.array([[scale, scale], [0.0, 0.0]], jnp.float32)
    return params


def relation_extractor_forward(params, words_embedding, src_mask, p_head,
                               p_tail_idx, words_ti_value, relation,
                               label_smoothing=0.1, score_tile=512):
    # TODO(synk): getQuestionEmbedding (RoBERTa + tokenizer post-processing) is an
    # external pretrained model; `words_embedding`/`src_mask` are taken as inputs.
    B, S, H = words_embedding.shape
    d_model = params["b2t_w"].shape[1]
    num_entities, ent_dim = params["entity_emb"].shape
    half = ent_dim // 2

    # relation branch: both relation columns through halfRelDim2Tranf in ONE call
    rel_idx = jnp.concatenate([relation[:, 0], relation[:, 1]], axis=0)   # [2B]
    rel_e = jnp.take(params["rel_emb"], rel_idx, axis=0)                  # [2B, rd]
    r12 = linear(rel_e, params["half_w"], params["half_b"])               # [2B, 256]
    trg_rel_emb = jnp.concatenate([r12[:B], r12[B:]], axis=1)[:, None, :]  # [B,1,512]

    # bert2tranf on word embeddings
    words = linear(words_embedding.reshape(B * S, H),
                   params["b2t_w"], params["b2t_b"]).reshape(B, S, d_model)

    # TODO(synk): words_ti_value_haddle depends on tokenizer string matching; here
    # each per-token ti value is broadcast over d_model INSIDE the kernel.
    ti = words_ti_value[:, :, None].astype(jnp.float32)                   # [B,S,1]

    # Ti-based Transformer (approximated) -> first target position
    attn_out = cross_attention(trg_rel_emb, words, ti,
                               src_mask.astype(jnp.float32))
    temp = attn_out[:, 0, :]                                              # [B, 512]

    # applyNonLinear
    rel_embedding = linear(temp, params["h2r_w"], params["h2r_b"])        # [B, ent_dim]

    # head entity lookup (pointwise math stays f32)
    head = jnp.take(params["entity_emb"], p_head, axis=0).astype(jnp.float32)

    # eval-mode BatchNorm1d(2) folded to lane-wide scale/shift vectors
    bn_pack = jnp.stack([
        jnp.repeat(params["bn0"][0], half),
        jnp.repeat(params["bn0"][1], half),
        jnp.repeat(params["bn2"][0], half),
        jnp.repeat(params["bn2"][1], half),
    ], axis=0)                                                            # [4, ent_dim]

    # fused ComplEx scoring + kge_loss; freeze=True -> no l3 regularization term.
    # TODO(synk): index-based targets cover the single-answer (one-hot p_tail)
    # case; multi-answer k-hot targets would need a dense-target loss path.
    return complex_score_kge_loss(head, rel_embedding, bn_pack,
                                  params["entity_emb"], p_tail_idx,
                                  num_entities=num_entities,
                                  label_smoothing=label_smoothing,
                                  tile_e=score_tile)


# ----------------------------------------------------------------------------
# Driver
# ----------------------------------------------------------------------------

if __name__ == "__main__":
    B, S = 2, 8
    HIDDEN = 768          # RoBERTa hidden size (fixed by the module)
    D_MODEL = 512         # Transformer d_word_vec (fixed by the module)
    REL_DIM_BASE = 64     # constructor arg `relation_dim`
    ENT_DIM = 2 * REL_DIM_BASE        # ComplEx: entity dim = 2 * relation_dim
    REL_OUT_DIM = 2 * REL_DIM_BASE    # self.relation_dim for ComplEx
    NUM_ENTITIES = 1500   # deliberately NOT a tile multiple: exercises tail mask
    NUM_RELATIONS = 16

    key = jax.random.PRNGKey(0)
    kp, k1, k2, k3, k4, k5 = jax.random.split(key, 6)

    params = make_params(
        kp, num_entities=NUM_ENTITIES, num_relations=NUM_RELATIONS,
        ent_dim=ENT_DIM, rel_emb_dim=REL_OUT_DIM, hidden_dim=HIDDEN,
        d_model=D_MODEL, relation_dim_out=REL_OUT_DIM)

    words_embedding = jax.random.normal(k1, (B, S, HIDDEN), jnp.float32)
    src_mask = jnp.ones((B, S), jnp.float32)
    p_head = jax.random.randint(k2, (B,), 0, NUM_ENTITIES)
    p_tail_idx = jax.random.randint(k3, (B,), 0, NUM_ENTITIES)   # answer indices
    words_ti_value = jax.random.uniform(k4, (B, S), jnp.float32)
    relation = jax.random.randint(k5, (B, 2), 0, NUM_RELATIONS)

    loss = relation_extractor_forward(
        params, words_embedding, src_mask, p_head, p_tail_idx,
        words_ti_value, relation, label_smoothing=0.1, score_tile=512)
    loss = jax.block_until_ready(loss)
    assert jnp.isfinite(loss)
    print("KERNEL_OK")
</pallas_src>

<mosaic_0001>
module attributes {stable_mosaic.version = 11 : i64} {
  func.func @_linear_kernel(%arg0: memref<4x128xf32, #tpu.memory_space<vmem>>, %arg1: memref<128x256xbf16, #tpu.memory_space<vmem>>, %arg2: memref<1x256xf32, #tpu.memory_space<vmem>>, %arg3: memref<4x256xf32, #tpu.memory_space<vmem>>) attributes {dimension_semantics = [], scalar_prefetch = 0 : i64, scratch_operands = 0 : i64, tpu.core_type = #tpu.core_type<tc>} {
    %c0 = arith.constant 0 : index
    %c0_0 = arith.constant 0 : index
    %0 = vector.load %arg0[%c0, %c0_0] : memref<4x128xf32, #tpu.memory_space<vmem>>, vector<4x128xf32>
    %1 = arith.truncf %0 : vector<4x128xf32> to vector<4x128xbf16>
    %c0_1 = arith.constant 0 : index
    %c0_2 = arith.constant 0 : index
    %2 = vector.load %arg1[%c0_1, %c0_2] : memref<128x256xbf16, #tpu.memory_space<vmem>>, vector<128x256xbf16>
    %cst = arith.constant dense<0.000000e+00> : vector<4x256xf32>
    %3 = tpu.matmul %1, %2, %cst {dimension_numbers = #tpu.dot_dimension_numbers<[1], [0], [0], [1], [0, 0, 1, 1], [], []>} : vector<4x128xbf16>, vector<128x256xbf16>, vector<4x256xf32> -> vector<4x256xf32>
    %c0_3 = arith.constant 0 : index
    %c0_4 = arith.constant 0 : index
    %4 = vector.load %arg2[%c0_3, %c0_4] : memref<1x256xf32, #tpu.memory_space<vmem>>, vector<1x256xf32>
    %5 = vector.broadcast %4 : vector<1x256xf32> to vector<4x256xf32>
    %6 = arith.addf %3, %5 : vector<4x256xf32>
    %c0_5 = arith.constant 0 : index
    %c0_6 = arith.constant 0 : index
    %7 = vector.load %arg3[%c0_5, %c0_6] : memref<4x256xf32, #tpu.memory_space<vmem>>, vector<4x256xf32>
    tpu.vector_store %arg3[%c0_5, %c0_6], %6 {strides = array<i32>} : memref<4x256xf32, #tpu.memory_space<vmem>>, vector<4x256xf32>,
    return
  }
}

</mosaic_0001>

<bundles_post_ra>
// kernel: tpu_custom_call.1
= control target key start
LH: loop header
LB: loop body
LE: loop exit
PB: predicated region body
PF: predicated region fallthrough
CT: control target
= control target key end

     0   :  { %8 = vsyncpa [#allocation3], 0  ;;  %s404_s0 = inlined_call_operand.hbm [shape: f32[4,128], index: 0, kind: input, shape index: {}]   ;;  %s405_s1 = inlined_call_operand.hbm [shape: bf16[128,256], index: 1, kind: input, shape index: {}]   ;;  %s406_s2 = inlined_call_operand.vmem [shape: f32[1,256], index: 2, kind: input, shape index: {}]   ;;  %s407_s3 = inlined_call_operand.hbm [shape: f32[4,256], index: 3, kind: output, shape index: {}]  }
   0x1   :  { %9 = vsyncpa [#allocation6], 0 }
   0x2   :  { %10 = vsyncpa [#allocation4], 0  ;;  %s332_s12 = smov [#allocation2]   ;;  %s333_s14 = smov [#allocation5]  }
   0x3   :  { %s17_s13 = sshll.u32 %s332_s12, 4  ;;  %s26_s15 = sshll.u32 %s333_s14, 4  ;;  %s18_s13 = int_to_ptr.vmem [resolvable:$true] %s17_s13  ;;  %s358_s15 = int_to_ptr.vmem [resolvable:$true] %s26_s15 }
   0x4   :  { %s260_s18 = scalar_lea.hbm %s404_s0, 64 }
   0x5   :  { %p261_p0 = scmp.ne.s32.totalorder %s404_s0, %s260_s18  ;;  %p264_p1 = scmp.lt.u32.totalorder %s260_s18, %s404_s0 }
   0x7   :  { %p266_p2 = pnand %p264_p1, %p261_p0 }
   0x9   :  { %269 = shalt.err (!%p266_p2)
}
   0xa   :  { %s270_s23 = scalar_lea.vmem %s18_s13, 64  ;;  %p275_p4 = scmp.lt.s32.totalorder %s18_s13, %s18_s13 }
   0xb   :  { %p271_p3 = scmp.ne.s32.totalorder %s18_s13, %s270_s23  ;;  %p276_p5 = scmp.lt.s32.totalorder %s270_s23, %s270_s23 }
   0xd   :  { %p277_p6 = por %p276_p5, %p275_p4 }
   0xf   :  { %p278_p7 = pnand %p277_p6, %p271_p3 }
  0x11   :  { %281 = shalt.err (!%p278_p7)
}
  0x12   :  { %20 = dma.hbm_to_vmem [thread:$0]  %s404_s0, 64, %s18_s13, [#allocation3]  }
  0x13   :  { %s282_s28 = scalar_lea.hbm %s405_s1, 2048 }
  0x14   :  { %p283_p8 = scmp.ne.s32.totalorder %s405_s1, %s282_s28  ;;  %p286_p9 = scmp.lt.u32.totalorder %s282_s28, %s405_s1 }
  0x16   :  { %p288_p10 = pnand %p286_p9, %p283_p8 }
  0x18   :  { %291 = shalt.err (!%p288_p10)
}
  0x19   :  { %s292_s6 = scalar_lea.vmem %s358_s15, 2048  ;;  %p297_p12 = scmp.lt.s32.totalorder %s358_s15, %s358_s15 }
  0x1a   :  { %p293_p11 = scmp.ne.s32.totalorder %s358_s15, %s292_s6  ;;  %p298_p13 = scmp.lt.s32.totalorder %s292_s6, %s292_s6 }
  0x1c   :  { %p299_p0 = por %p298_p13, %p297_p12 }
  0x1e   :  { %p300_p1 = pnand %p299_p0, %p293_p11 }
  0x20   :  { %303 = shalt.err (!%p300_p1)
}
  0x21   :  { %s334_s0 = smov 128   ;;  %s335_s7 = smov 8  }
  0x22   :  { %32 = dma.hbm_to_vmem [thread:$0]  %s405_s1, 2048, %s358_s15, [#allocation6], %s334_s0, %s334_s0, %s335_s7  }
  0x23   :  { %326 = dma.done.wait [#allocation3], 64  }
  0x24   :  { %327 = vsyncadd [#allocation3], 4294967232 }
  0x25   :  { %328 = dma.done.wait [#allocation6], 2048  }
  0x26   :  { %329 = vsyncadd [#allocation6], 4294965248  ;;  %v336_v0 = vmov 0   ;;  %v236_v1 = vld [vmem:[#allocation5 + $0x4] ss:$8 sps:$4 sm:$0xff]   ;;  %v62_v19 = vlaneseq  ;;  %s337_s11 = smov [#allocation7]  }
  0x27   :  { %184 = vmatprep.mubr.bf16.mxu0 %v336_v0  ;;  %v238_v2 = vld [vmem:[#allocation5] ss:$8 sps:$4 sm:$0xff]   ;;  %152 = vmatprep.subr.bf16.mxu0 %v236_v1  ;;  %v239_v3 = vld [vmem:[#allocation5 + $0x14] ss:$8 sps:$4 sm:$0xff]   ;;  %v241_v4 = vld [vmem:[#allocation5 + $0x10] ss:$8 sps:$4 sm:$0xff]  }
  0x28   :  { %153 = vmatpush1.bf16.msra.mxu0 %v238_v2  ;;  %v242_v5 = vld [vmem:[#allocation5 + $0x24] ss:$8 sps:$4 sm:$0xff]   ;;  %v244_v6 = vld [vmem:[#allocation5 + $0x20] ss:$8 sps:$4 sm:$0xff]   ;;  %v245_v7 = vld [vmem:[#allocation5 + $0x34] ss:$8 sps:$4 sm:$0xff]  }
  0x29   :  { %154 = vmatprep.subr.bf16.mxu0 %v239_v3  ;;  %v247_v8 = vld [vmem:[#allocation5 + $0x30] ss:$8 sps:$4 sm:$0xff]   ;;  %v248_v9 = vld [vmem:[#allocation5 + $0x44] ss:$8 sps:$4 sm:$0xff]   ;;  %v250_v10 = vld [vmem:[#allocation5 + $0x40] ss:$8 sps:$4 sm:$0xff]  }
  0x2a   :  { %v251_v11 = vld [vmem:[#allocation5 + $0x54] ss:$8 sps:$4 sm:$0xff]   ;;  %v253_v12 = vld [vmem:[#allocation5 + $0x50] ss:$8 sps:$4 sm:$0xff]   ;;  %v254_v13 = vld [vmem:[#allocation5 + $0x64] ss:$8 sps:$4 sm:$0xff]  }
  0x2b   :  { %v256_v14 = vld [vmem:[#allocation5 + $0x60] ss:$8 sps:$4 sm:$0xff]   ;;  %v257_v15 = vld [vmem:[#allocation5 + $0x74] ss:$8 sps:$4 sm:$0xff]   ;;  %v259_v16 = vld [vmem:[#allocation5 + $0x70] ss:$8 sps:$4 sm:$0xff]  }
  0x2c   :  { %155 = vmatpush1.bf16.msra.mxu0 %v241_v4  ;;  %v42_v17 = vld [vmem:[#allocation2] sm:$0xf]  ;;  %v63_v20 = vshrl.u32 %v62_v19, 7  ;;  %s204_s12 = sshll.u32 %s337_s11, 4  ;;  %s205_s12 = int_to_ptr.vmem [resolvable:$true] %s204_s12 }
  0x2d   :  { %156 = vmatprep.subr.bf16.mxu0 %v242_v5  ;;  %v43_v18 = vpack.c.bf16 %v42_v17, %v42_v17  ;;  %v60_v22 = vld [vmem:[%s406_s2] sm:$0x3]  ;;  %s304_s13 = scalar_lea.vmem %s205_s12, 128  ;;  %p309_p3 = scmp.lt.s32.totalorder %s205_s12, %s205_s12 }
  0x2e   :  { %v64_v21 = vsub.s32 0, %v63_v20  ;;  %v68_v23 = vsub.s32 1, %v63_v20  ;;  %p305_p2 = scmp.ne.s32.totalorder %s205_s12, %s304_s13  ;;  %p310_p4 = scmp.lt.s32.totalorder %s304_s13, %s304_s13 }
  0x30   :  { %157 = vmatpush1.bf16.msra.mxu0 %v244_v6  ;;  %v65_v24 = vrot.slane %v60_v22, %v64_v21  ;;  %v69_v25 = vrot.slane %v60_v22, %v68_v23  ;;  %p311_p5 = por %p310_p4, %p309_p3 }
  0x31   :  { %158 = vmatprep.subr.bf16.mxu0 %v245_v7 }
  0x32   :  { %p312_p6 = pnand %p311_p5, %p305_p2 }
  0x34   :  { %159 = vmatpush1.bf16.msra.mxu0 %v247_v8 }
  0x35   :  { %160 = vmatprep.subr.bf16.mxu0 %v248_v9 }
  0x38   :  { %161 = vmatpush1.bf16.msra.mxu0 %v250_v10 }
  0x39   :  { %162 = vmatprep.subr.bf16.mxu0 %v251_v11 }
  0x3c   :  { %163 = vmatpush1.bf16.msra.mxu0 %v253_v12 }
  0x3d   :  { %164 = vmatprep.subr.bf16.mxu0 %v254_v13 }
  0x40   :  { %165 = vmatpush1.bf16.msra.mxu0 %v256_v14 }
  0x41   :  { %166 = vmatprep.subr.bf16.mxu0 %v257_v15 }
  0x44   :  { %167 = vmatpush1.bf16.msra.mxu0 %v259_v16 }
  0x47   :  { %185 = vmatmul.mubr.bf16.vlgmr.msra.gmra.mrb[0].mxu0 %v43_v18 }
 0x11a   :  { %v186_v26 = vpop.f32.mrb[0].mxu0 }
 0x11b   :  { %v187_v27 = vadd.f32 %v186_v26, %v65_v24  ;;  %v188_v28 = vpop.f32.mrb[1].mxu0 }
 0x11c   :  { %v189_v29 = vadd.f32 %v188_v28, %v69_v25  ;;  %v190_v30 = vpop.f32.mrb[2].mxu0 }
 0x11d   :  { %v191_v31 = vpop.f32.mrb[3].mxu0 }
 0x11e   :  { %v195_v32 = vcombine.low %v187_v27, %v189_v29 }
 0x120   :  { %197 = vst [vmem:[#allocation7] sm:$0xff] %v195_v32 }
 0x121   :  { %315 = shalt.err (!%p312_p6)
}
 0x122   :  { %s316_s15 = scalar_lea.hbm %s407_s3, 128 }
 0x123   :  { %p317_p7 = scmp.ne.s32.totalorder %s407_s3, %s316_s15  ;;  %p320_p8 = scmp.lt.u32.totalorder %s316_s15, %s407_s3 }
 0x125   :  { %p322_p9 = pnand %p320_p8, %p317_p7 }
 0x127   :  { %325 = shalt.err (!%p322_p9)
}
 0x128   :  { %207 = dma.vmem_to_hbm [thread:$0]  %s205_s12, 128, %s407_s3, [#allocation4]  }
 0x129   :  { %330 = dma.done.wait [#allocation4], 128  }
 0x12a   :  { %331 = vsyncadd [#allocation4], 4294967168 }
 0x12b   :  { %211 = vsyncpa [#allocation3], 1 }
 0x12c   :  { %212 = vsyncpa [#allocation6], 1 }
 0x12d   :  { %213 = vsyncpa [#allocation4], 1 }

</bundles_post_ra>
